<compile_context>
chip_gen: v5e
topology: v5e:2x2
jax: 0.10.0
libtpu: 0.0.40
codegen_flags: <defaults>
</compile_context>

<pallas_src>
import functools

import jax
import jax.numpy as jnp
from jax.experimental import pallas as pl
from jax.experimental.pallas import tpu as pltpu

LANE = 128


def _round_up(n: int, m: int) -> int:
    return ((n + m - 1) // m) * m


# ---------------------------------------------------------------------------
# Kernel
# ---------------------------------------------------------------------------
def mlp_kernel(x_ref, w1_ref, b1_ref, w2_ref, b2_ref, o_ref):
    x = x_ref[...]
    # Cast activations to the weight dtype inside the kernel (VPU filler under
    # the MXU slot) -- avoids a separate XLA cast pass over x in the wrapper.
    if x.dtype != w1_ref.dtype:
        x = x.astype(w1_ref.dtype)
    # fc1: x @ W1 (MXU, f32 accumulation), + b1 (f32), ReLU.
    h = jnp.dot(x, w1_ref[...], preferred_element_type=jnp.float32)
    h = jnp.maximum(h + b1_ref[...].astype(jnp.float32), 0.0)
    if w2_ref.dtype != jnp.float32:
        h = h.astype(w2_ref.dtype)
    # fc2: h @ W2 + b2.
    out = jnp.dot(h, w2_ref[...], preferred_element_type=jnp.float32)
    out = out + b2_ref[...].astype(jnp.float32)
    o_ref[...] = out.astype(o_ref.dtype)


# ---------------------------------------------------------------------------
# One-time parameter preparation (padding + dtype cast happen ONCE, not per call)
# ---------------------------------------------------------------------------
def prepare_params(w1, b1, w2, b2, compute_dtype=jnp.bfloat16):
    """Pad hidden/out dims to multiples of 128 and cast weights once.

    w1: [in, hidden], b1: [1, hidden], w2: [hidden, out], b2: [1, out]
    (i.e. transposed vs. torch's nn.Linear weight layout).

    Zero padding is numerically exact: ReLU(0)=0 and zero W2 rows contribute 0.
    Weights are cast to `compute_dtype` (bf16 by default: MXU-native on
    v6e/v7x, halves weight DMA + resident VMEM); biases stay f32 and are added
    on the VPU after f32 accumulation.  Pass compute_dtype=jnp.float32 for an
    exact f32 path, or None to keep the original dtypes.
    """
    H = w1.shape[1]
    O = w2.shape[1]
    Hp = _round_up(H, LANE)
    Op = _round_up(O, LANE)
    w1p = jnp.pad(w1, ((0, 0), (0, Hp - H)))
    b1p = jnp.pad(b1, ((0, 0), (0, Hp - H))).astype(jnp.float32)
    w2p = jnp.pad(w2, ((0, Hp - H), (0, Op - O)))
    b2p = jnp.pad(b2, ((0, 0), (0, Op - O))).astype(jnp.float32)
    if compute_dtype is not None:
        w1p = w1p.astype(compute_dtype)
        w2p = w2p.astype(compute_dtype)
    return w1p, b1p, w2p, b2p


# ---------------------------------------------------------------------------
# pallas_call wrappers
# ---------------------------------------------------------------------------
def _mlp_single_block(x, w1, b1, w2, b2):
    """Ungridded call for tiny batches: whole problem resident in VMEM."""
    B = x.shape[0]
    Op = w2.shape[1]
    vmem = pl.BlockSpec(memory_space=pltpu.MemorySpace.VMEM)
    return pl.pallas_call(
        mlp_kernel,
        out_shape=jax.ShapeDtypeStruct((B, Op), x.dtype),
        in_specs=[vmem] * 5,
        out_specs=vmem,
    )(x, w1, b1, w2, b2)


def _vmem_limit_bytes(tile, K, Hp, Op, x_itemsize, w_itemsize):
    """Scoped-VMEM request sized from resident weights + double-buffered tiles."""
    weights = 2 * ((K * Hp + Hp * Op) * w_itemsize + (Hp + Op) * 4)
    io_tiles = 2 * tile * (K + Op) * x_itemsize           # double-buffered x / out
    interm = 2 * tile * (Hp + Op) * 4                     # f32 h / out temporaries
    est = weights + io_tiles + interm + (8 << 20)         # compiler scratch headroom
    # >=32 MiB raises v5e's 16 MiB scoped default; <=64 MiB stays valid on v7x.
    return max(32 << 20, min(est, 64 << 20))


def _mlp_batch_grid(x, w1, b1, w2, b2, block_b):
    """Batch-tiled call: weights stay resident, x/out tiles pipeline.

    No batch padding: grid = cdiv(B, tile); the ragged last block is safe
    because every row is computed independently and out-of-bounds rows are
    masked on the output write.
    """
    B, K = x.shape
    Hp = w1.shape[1]
    Op = w2.shape[1]
    # At least 2 grid steps (megacore sharding on v7x), at most `block_b` rows
    # per step; tile kept a multiple of 8 (sublane) for the ragged case.
    tile = min(block_b, _round_up((B + 1) // 2, 8))
    grid = (pl.cdiv(B, tile),)
    vmem_limit = _vmem_limit_bytes(
        tile, K, Hp, Op, jnp.dtype(x.dtype).itemsize, jnp.dtype(w1.dtype).itemsize)
    return pl.pallas_call(
        mlp_kernel,
        out_shape=jax.ShapeDtypeStruct((B, Op), x.dtype),
        grid=grid,
        in_specs=[
            pl.BlockSpec((tile, K), lambda i: (i, 0)),
            # Grid-invariant operands (constant index_map) -> resident, no re-DMA.
            pl.BlockSpec((K, Hp), lambda i: (0, 0)),
            pl.BlockSpec((1, Hp), lambda i: (0, 0)),
            pl.BlockSpec((Hp, Op), lambda i: (0, 0)),
            pl.BlockSpec((1, Op), lambda i: (0, 0)),
        ],
        out_specs=pl.BlockSpec((tile, Op), lambda i: (i, 0)),
        compiler_params=pltpu.CompilerParams(
            dimension_semantics=("parallel",),
            vmem_limit_bytes=int(vmem_limit)),
    )(x, w1, b1, w2, b2)


@functools.partial(jax.jit, static_argnames=("out_dim", "block_b"))
def neural_net_forward(x, params, *, out_dim=None, block_b=1024):
    """Forward pass of the 2-layer MLP.

    x: [B, input_num]; params = prepare_params(...) = (w1p, b1p, w2p, b2p).
    Returns [B, out_dim] (or the lane-dense padded slab if out_dim is None).
    """
    w1p, b1p, w2p, b2p = params
    B = x.shape[0]
    if B < 512:
        # Tiny batch: single all-VMEM invocation, zero grid/pipeline overhead.
        out = _mlp_single_block(x, w1p, b1p, w2p, b2p)
    else:
        out = _mlp_batch_grid(x, w1p, b1p, w2p, b2p, block_b)
    # Slice the lane-dense slab back to the true width (skipped if the caller
    # accepts the padded slab, which saves one XLA pass over the output).
    if out_dim is not None and out_dim != w2p.shape[1]:
        out = out[:, :out_dim]
    return out


def init_params(key, input_num, hidden_size, out_put, dtype=jnp.float32):
    """Deterministic init mimicking PyTorch nn.Linear (uniform +/- 1/sqrt(fan_in))."""
    k1, k2, k3, k4 = jax.random.split(key, 4)
    bound1 = 1.0 / (input_num ** 0.5)
    bound2 = 1.0 / (hidden_size ** 0.5)
    w1 = jax.random.uniform(k1, (input_num, hidden_size), dtype, -bound1, bound1)
    b1 = jax.random.uniform(k2, (1, hidden_size), dtype, -bound1, bound1)
    w2 = jax.random.uniform(k3, (hidden_size, out_put), dtype, -bound2, bound2)
    b2 = jax.random.uniform(k4, (1, out_put), dtype, -bound2, bound2)
    return w1, b1, w2, b2


if __name__ == "__main__":
    input_num, hidden_size, out_put = 32, 100, 10

    key = jax.random.PRNGKey(0)
    kx, kp, kx2 = jax.random.split(key, 3)
    w1, b1, w2, b2 = init_params(kp, input_num, hidden_size, out_put)

    def ref_forward(xx):
        return jnp.maximum(xx @ w1 + b1, 0.0) @ w2 + b2

    # --- small batch, f32 params: single ungridded all-VMEM call (exact) -----
    x = jax.random.normal(kx, (8, input_num), jnp.float32)
    p_f32 = prepare_params(w1, b1, w2, b2, compute_dtype=jnp.float32)
    out = jax.block_until_ready(neural_net_forward(x, p_f32, out_dim=out_put))
    assert out.shape == (8, out_put)
    assert jnp.allclose(out, ref_forward(x), atol=1e-5, rtol=1e-5)

    # --- large batch, f32 params: batch-tiled grid, ragged last block --------
    big_b = 1000
    xb = jax.random.normal(kx2, (big_b, input_num), jnp.float32)
    out_b = jax.block_until_ready(neural_net_forward(xb, p_f32, out_dim=out_put))
    ref_b = ref_forward(xb)
    assert out_b.shape == (big_b, out_put)
    assert jnp.allclose(out_b, ref_b, atol=1e-4, rtol=1e-4)

    # --- large batch, default bf16-operand params (f32 MXU accumulation) -----
    p_bf16 = prepare_params(w1, b1, w2, b2)  # bf16 weights by default
    out_bf = jax.block_until_ready(neural_net_forward(xb, p_bf16, out_dim=out_put))
    assert out_bf.shape == (big_b, out_put)
    assert jnp.allclose(out_bf, ref_b, atol=1e-1, rtol=5e-2)

    print("KERNEL_OK")
</pallas_src>

<mosaic_0001>
module attributes {stable_mosaic.version = 11 : i64} {
  func.func @mlp_kernel(%arg0: memref<8x32xf32, #tpu.memory_space<vmem>>, %arg1: memref<32x128xf32, #tpu.memory_space<vmem>>, %arg2: memref<1x128xf32, #tpu.memory_space<vmem>>, %arg3: memref<128x128xf32, #tpu.memory_space<vmem>>, %arg4: memref<1x128xf32, #tpu.memory_space<vmem>>, %arg5: memref<8x128xf32, #tpu.memory_space<vmem>>) attributes {dimension_semantics = [], scalar_prefetch = 0 : i64, scratch_operands = 0 : i64, tpu.core_type = #tpu.core_type<tc>} {
    %c0 = arith.constant 0 : index
    %c0_0 = arith.constant 0 : index
    %0 = vector.load %arg0[%c0, %c0_0] : memref<8x32xf32, #tpu.memory_space<vmem>>, vector<8x32xf32>
    %c0_1 = arith.constant 0 : index
    %c0_2 = arith.constant 0 : index
    %1 = vector.load %arg1[%c0_1, %c0_2] : memref<32x128xf32, #tpu.memory_space<vmem>>, vector<32x128xf32>
    %cst = arith.constant dense<0.000000e+00> : vector<8x128xf32>
    %2 = tpu.matmul %0, %1, %cst {dimension_numbers = #tpu.dot_dimension_numbers<[1], [0], [0], [1], [0, 0, 1, 1], [], []>} : vector<8x32xf32>, vector<32x128xf32>, vector<8x128xf32> -> vector<8x128xf32>
    %c0_3 = arith.constant 0 : index
    %c0_4 = arith.constant 0 : index
    %3 = vector.load %arg2[%c0_3, %c0_4] : memref<1x128xf32, #tpu.memory_space<vmem>>, vector<1x128xf32>
    %4 = vector.broadcast %3 : vector<1x128xf32> to vector<8x128xf32>
    %5 = arith.addf %2, %4 : vector<8x128xf32>
    %cst_5 = arith.constant 0.000000e+00 : f32
    %6 = vector.broadcast %cst_5 : f32 to vector<8x128xf32>
    %7 = arith.maximumf %5, %6 : vector<8x128xf32>
    %c0_6 = arith.constant 0 : index
    %c0_7 = arith.constant 0 : index
    %8 = vector.load %arg3[%c0_6, %c0_7] : memref<128x128xf32, #tpu.memory_space<vmem>>, vector<128x128xf32>
    %cst_8 = arith.constant dense<0.000000e+00> : vector<8x128xf32>
    %9 = tpu.matmul %7, %8, %cst_8 {dimension_numbers = #tpu.dot_dimension_numbers<[1], [0], [0], [1], [0, 0, 1, 1], [], []>} : vector<8x128xf32>, vector<128x128xf32>, vector<8x128xf32> -> vector<8x128xf32>
    %c0_9 = arith.constant 0 : index
    %c0_10 = arith.constant 0 : index
    %10 = vector.load %arg4[%c0_9, %c0_10] : memref<1x128xf32, #tpu.memory_space<vmem>>, vector<1x128xf32>
    %11 = vector.broadcast %10 : vector<1x128xf32> to vector<8x128xf32>
    %12 = arith.addf %9, %11 : vector<8x128xf32>
    %c0_11 = arith.constant 0 : index
    %c0_12 = arith.constant 0 : index
    %13 = vector.load %arg5[%c0_11, %c0_12] : memref<8x128xf32, #tpu.memory_space<vmem>>, vector<8x128xf32>
    tpu.vector_store %arg5[%c0_11, %c0_12], %12 {strides = array<i32>} : memref<8x128xf32, #tpu.memory_space<vmem>>, vector<8x128xf32>,
    return
  }
}

</mosaic_0001>

<bundles_post_ra>
// kernel: neural_net_forward.1
= control target key start
LH: loop header
LB: loop body
LE: loop exit
PB: predicated region body
PF: predicated region fallthrough
CT: control target
= control target key end

     0   :  { %10 = vsyncpa [#allocation3], 0  ;;  %s324_s0 = inlined_call_operand.hbm [shape: f32[8,32], index: 0, kind: input, shape index: {}]   ;;  %s325_s1 = inlined_call_operand.hbm [shape: f32[32,128], index: 1, kind: input, shape index: {}]   ;;  %s326_s2 = inlined_call_operand.vmem [shape: f32[1,128], index: 2, kind: input, shape index: {}]   ;;  %s327_s3 = inlined_call_operand.hbm [shape: f32[128,128], index: 3, kind: input, shape index: {}]   ;;  %s328_s4 = inlined_call_operand.vmem [shape: f32[1,128], index: 4, kind: input, shape index: {}]   ;;  %s329_s5 = inlined_call_operand.hbm [shape: f32[8,128], index: 5, kind: output, shape index: {}]  }
   0x1   :  { %11 = vsyncpa [#allocation6], 0  ;;  %s28_s20 = sshll.u32 %s325_s1, 4  ;;  %s29_s20 = int_to_ptr.hbm [resolvable:$true] %s28_s20 }
   0x2   :  { %12 = vsyncpa [#allocation4], 0  ;;  %s270_s21 = smov [#allocation5]   ;;  %s18_s25 = sshll.u32 %s324_s0, 4  ;;  %s19_s25 = int_to_ptr.hbm [resolvable:$true] %s18_s25 }
   0x3   :  { %s30_s22 = sshll.u32 %s270_s21, 4  ;;  %s271_s26 = smov 128   ;;  %s31_s22 = int_to_ptr.vmem [resolvable:$true] %s30_s22 }
   0x4   :  { %s272_s27 = smov 8   ;;  %s273_s28 = smov [#allocation2]  }
   0x5   :  { %36 = dma.hbm_to_vmem [thread:$0]  %s29_s20, 512, %s31_s22, [#allocation6], %s271_s26, %s271_s26, %s272_s27  }
   0x6   :  { %s20_s29 = sshll.u32 %s273_s28, 4  ;;  %s43_s7 = sshll.u32 %s327_s3, 4  ;;  %s21_s29 = int_to_ptr.vmem [resolvable:$true] %s20_s29  ;;  %s44_s7 = int_to_ptr.hbm [resolvable:$true] %s43_s7 }
   0x7   :  { %23 = dma.hbm_to_vmem [thread:$0]  %s19_s25, 128, %s21_s29, [#allocation3]  }
   0x8   :  { %s274_s1 = smov [#allocation7]  }
   0x9   :  { %s45_s8 = sshll.u32 %s274_s1, 4  ;;  %s46_s8 = int_to_ptr.vmem [resolvable:$true] %s45_s8 }
   0xa   :  { %51 = dma.hbm_to_vmem [thread:$0]  %s44_s7, 2048, %s46_s8, [#allocation6], %s271_s26, %s271_s26, %s272_s27  }
   0xb   :  { %264 = dma.done.wait [#allocation3], 128  }
   0xc   :  { %265 = vsyncadd [#allocation3], 4294967168 }
   0xd   :  { %266 = dma.done.wait [#allocation6], 2560  }
   0xe   :  { %267 = vsyncadd [#allocation6], 4294964736  ;;  %v70_v0 = vld [vmem:[#allocation5 + $0x18] sm:$0xff]  ;;  %v69_v1 = vld [vmem:[#allocation5 + $0x10] sm:$0xff]  ;;  %vm75_vm0 = vcmask 261120   ;;  %s275_s11 = smov [#allocation8]  }
   0xf   :  { %91 = vmatpush.msra.mxu0 %v70_v0  ;;  %v115_v2 = vld [vmem:[#allocation7 + $0x78] sm:$0xff]  ;;  %v68_v3 = vld [vmem:[#allocation5 + $0x8] sm:$0xff]  ;;  %v114_v4 = vld [vmem:[#allocation7 + $0x70] sm:$0xff]  ;;  %s146_s12 = sshll.u32 %s275_s11, 4  ;;  %s148_s15 = sshll.u32 %s329_s5, 4  ;;  %s147_s12 = int_to_ptr.vmem [resolvable:$true] %s146_s12  ;;  %s149_s15 = int_to_ptr.hbm [resolvable:$true] %s148_s15 }
  0x10   :  { %120 = vmatpush.msra.mxu1 %v115_v2  ;;  %v113_v5 = vld [vmem:[#allocation7 + $0x68] sm:$0xff]  ;;  %v67_v6 = vld [vmem:[#allocation5] sm:$0xff]  ;;  %v66_v7 = vld [vmem:[#allocation2] sm:$0xff] }
  0x11   :  { %92 = vmatpush.msra.mxu0 %v69_v1  ;;  %v112_v8 = vld [vmem:[#allocation7 + $0x60] sm:$0xff]  ;;  %v111_v9 = vld [vmem:[#allocation7 + $0x58] sm:$0xff]  ;;  %v110_v10 = vld [vmem:[#allocation7 + $0x50] sm:$0xff] }
  0x12   :  { %121 = vmatpush.msra.mxu1 %v114_v4  ;;  %v109_v11 = vld [vmem:[#allocation7 + $0x48] sm:$0xff]  ;;  %v108_v12 = vld [vmem:[#allocation7 + $0x40] sm:$0xff]  ;;  %v107_v13 = vld [vmem:[#allocation7 + $0x38] sm:$0xff] }
  0x13   :  { %93 = vmatpush.msra.mxu0 %v68_v3  ;;  %v106_v14 = vld [vmem:[#allocation7 + $0x30] sm:$0xff]  ;;  %v105_v15 = vld [vmem:[#allocation7 + $0x28] sm:$0xff]  ;;  %v104_v16 = vld [vmem:[#allocation7 + $0x20] sm:$0xff] }
  0x14   :  { %122 = vmatpush.msra.mxu1 %v113_v5  ;;  %v103_v17 = vld [vmem:[#allocation7 + $0x18] sm:$0xff]  ;;  %v102_v18 = vld [vmem:[#allocation7 + $0x10] sm:$0xff]  ;;  %v101_v19 = vld [vmem:[#allocation7 + $0x8] sm:$0xff] }
  0x15   :  { %94 = vmatpush.msra.mxu0 %v67_v6  ;;  %v100_v20 = vld [vmem:[#allocation7] sm:$0xff]  ;;  %v166_v21 = vld [vmem:[%s326_s2] ss:$0 sm:$0xff] }
  0x16   :  { %159 = vmatmul.msk.f32.vlgmr.msra.gmra.mxu0 %vm75_vm0, %v66_v7  ;;  %123 = vmatpush.msra.mxu1 %v112_v8  ;;  %v167_v25 = vld [vmem:[%s328_s4] ss:$0 sm:$0xff] }
  0x18   :  { %124 = vmatpush.msra.mxu1 %v111_v9 }
  0x1a   :  { %125 = vmatpush.msra.mxu1 %v110_v10 }
  0x1c   :  { %126 = vmatpush.msra.mxu1 %v109_v11 }
  0x1e   :  { %127 = vmatpush.msra.mxu1 %v108_v12 }
  0x20   :  { %128 = vmatpush.msra.mxu1 %v107_v13 }
  0x22   :  { %129 = vmatpush.msra.mxu1 %v106_v14 }
  0x24   :  { %130 = vmatpush.msra.mxu1 %v105_v15 }
  0x26   :  { %131 = vmatpush.msra.mxu1 %v104_v16 }
  0x28   :  { %132 = vmatpush.msra.mxu1 %v103_v17 }
  0x2a   :  { %133 = vmatpush.msra.mxu1 %v102_v18 }
  0x2c   :  { %134 = vmatpush.msra.mxu1 %v101_v19 }
  0x2e   :  { %135 = vmatpush.msra.mxu1 %v100_v20 }
  0x93   :  { %v96_v22 = vpop.f32.mrf.mxu0 }
  0x94   :  { %v97_v23 = vadd.f32 %v166_v21, %v96_v22 }
  0x96   :  { %v99_v24 = vmax.f32 %v97_v23, 0.0 }
  0x98   :  { %136 = vmatmul.f32.vlgmr.msra.gmra.mxu1 %v99_v24 }
 0x115   :  { %v137_v26 = vpop.f32.mrf.mxu1 }
 0x116   :  { %v138_v27 = vadd.f32 %v167_v25, %v137_v26 }
 0x118   :  { %140 = vst [vmem:[#allocation8] sm:$0xff] %v138_v27 }
 0x119   :  { %151 = dma.vmem_to_hbm [thread:$0]  %s147_s12, 128, %s149_s15, [#allocation4]  }
 0x11a   :  { %268 = dma.done.wait [#allocation4], 128  }
 0x11b   :  { %269 = vsyncadd [#allocation4], 4294967168 }
 0x11c   :  { %156 = vsyncpa [#allocation3], 1 }
 0x11d   :  { %157 = vsyncpa [#allocation6], 1 }
 0x11e   :  { %158 = vsyncpa [#allocation4], 1 }

</bundles_post_ra>
